<compile_context>
chip_gen: v7x
topology: tpu7x:2x2x1
jax: 0.10.0
libtpu: 0.0.40
codegen_flags: <defaults>
</compile_context>

<pallas_src>
import functools
import numpy as np
import jax
import jax.numpy as jnp
from jax import lax
from jax.experimental import pallas as pl
from jax.experimental.pallas import tpu as pltpu

_NEG_INF = -1e30


def _vmem_bytes(tm, tn, d, n_pad):
    """Rough scoped-VMEM footprint for one pipelined configuration."""
    in_blocks = 2 * (tm + tn) * d * 2      # double-buffered bf16 row/col blocks
    temps = 4 * tm * tn * 4                # (TM, TN) f32 sim/mask/prob temporaries
    labels = 2 * (n_pad + tm) * 4          # resident column labels + row-label block
    scratch = 2 * tm * 4 + 2 * 8 * 128 * 4
    return in_blocks + temps + labels + scratch


def _choose_tiles(n_pad, d, budget=40 * 1024 * 1024):
    """Maximize TM first (column-block reuse / HBM traffic), then TN, under a VMEM budget
    that is safe on all generations (v7x has only 64 MiB physical VMEM per TensorCore)."""
    for tm in (1024, 768, 512, 384, 256, 128):
        if n_pad % tm:
            continue
        if tm > 128 and n_pad // tm < 2:
            continue                        # keep >= 2 row blocks so both v7x cores get work
        for tn in (512, 256, 128):
            if n_pad % tn:
                continue
            if _vmem_bytes(tm, tn, d, n_pad) <= budget:
                return tm, tn
    # TODO(synk): for very large D (>~4-8K) add a K(D) grid axis with a (TM,TN) f32
    # accumulator instead of falling back to minimal tiles.
    return 128, 128


def _ntxent_lse_kernel(row_lab_ref, col_lab_ref, rows_ref, cols_ref, out_ref,
                       m_ref, l_ref, *, batch_size, tm, tn, n_valid, n_pad):
    i = pl.program_id(0)   # row block (parallel)
    j = pl.program_id(1)   # column block (reduction / arbitrary)

    @pl.when(j == 0)
    def _init():
        m_ref[...] = jnp.full_like(m_ref, _NEG_INF)   # running max
        l_ref[...] = jnp.zeros_like(l_ref)            # running sum of exp

    # (TM, TN) similarity tile on the MXU: bf16 operands, fp32 accumulation.
    # 1/temperature is folded into the operand scaling, so sim == logits already.
    logits = lax.dot_general(rows_ref[...], cols_ref[...],
                             (((1,), (1,)), ((), ())),
                             preferred_element_type=jnp.float32)

    # Structural mask from (TM,1)/(1,TN) iotas: one broadcast subtract + scalar compares.
    row_g = i * tm + lax.broadcasted_iota(jnp.int32, (tm, 1), 0)      # (TM, 1)
    col_g = j * tn + lax.broadcasted_iota(jnp.int32, (1, tn), 1)      # (1, TN)
    delta = row_g - col_g                                             # (TM, TN)
    struct = (delta == 0) | (delta == batch_size) | (delta == -batch_size)

    # Column labels are VMEM-resident; slice the current (1, TN) window (lane-aligned).
    col_start = pl.multiple_of(j * tn, tn)
    lab_row = col_lab_ref[:, pl.ds(col_start, tn)]                    # (1, TN)
    same = row_lab_ref[...] == lab_row                                # (TM, TN)

    # selected = positives U negatives = same-label | not-structural.
    selected = same | jnp.logical_not(struct)
    if n_valid < n_pad:                                               # drop padded columns
        selected = selected & (col_g < n_valid)

    masked = jnp.where(selected, logits, jnp.float32(_NEG_INF))

    # Online log-sum-exp update.
    m_prev = m_ref[...]
    m_new = jnp.maximum(m_prev, jnp.max(masked, axis=-1, keepdims=True))
    p = jnp.exp(masked - m_new)
    l_ref[...] = jnp.exp(m_prev - m_new) * l_ref[...] + jnp.sum(p, axis=-1, keepdims=True)
    m_ref[...] = m_new

    @pl.when(j == pl.num_programs(1) - 1)
    def _finalize():
        lse = m_ref[...] + jnp.log(l_ref[...])                        # (TM, 1)
        if n_valid < n_pad:
            lse = jnp.where(row_g < n_valid, lse, 0.0)                # drop padded rows
        block_sum = jnp.sum(lse)
        # One lane-dense (8,128) tile per row block; block sum sits at [0, 0].
        sub = lax.broadcasted_iota(jnp.int32, (8, 128), 0)
        lane = lax.broadcasted_iota(jnp.int32, (8, 128), 1)
        out_ref[...] = jnp.where((sub == 0) & (lane == 0), block_sum, 0.0)


def ntxent_loss_class(zis, zjs, lis, ljs, *, batch_size, temperature,
                      use_cosine_similarity=True, compute_dtype=jnp.bfloat16):
    """Pallas implementation of NTXentLossClass.forward. zis/zjs: (B, D); lis/ljs: (B,)."""
    # Mirrors the torch forward: reps = cat([zjs, zis]) but labels = cat([lis, ljs]).
    # (Only semantically meaningful with balanced classes / lis == ljs, as in the original.)
    reps = jnp.concatenate([zjs, zis], axis=0)                          # (2B, D)
    labels = jnp.concatenate([lis, ljs], axis=0).astype(jnp.int32)      # (2B,)
    n, d = reps.shape
    assert n == 2 * batch_size

    # Fold 1/temperature into both operands (1/sqrt(T) each); normalize once for cosine.
    inv_sqrt_t = 1.0 / float(np.sqrt(float(temperature)))
    r32 = reps.astype(jnp.float32)
    if use_cosine_similarity:
        nrm2 = jnp.sum(r32 * r32, axis=-1, keepdims=True)
        # eps on each row norm (~1e-8) vs torch's eps on the norm product: negligible diff.
        r32 = r32 * (lax.rsqrt(jnp.maximum(nrm2, 1e-16)) * inv_sqrt_t)
    else:
        # TODO(synk): bf16 operand rounding can perturb large unnormalized dot products;
        # pass compute_dtype=jnp.float32 for an f32-operand path if that matters.
        r32 = r32 * inv_sqrt_t
    reps_c = r32.astype(compute_dtype)                                  # MXU operands

    # Target logit (positives[:, 0]) = logit at the first same-label column (row-major
    # torch boolean-mask order, diagonal included).  Computed outside the kernel:
    # j0[r] via sort + segment-min (O(N log N)), then an N*D gather/dot.
    order = jnp.argsort(labels)
    sorted_labels = labels[order]
    seg_start = jnp.concatenate(
        [jnp.ones((1,), jnp.bool_), sorted_labels[1:] != sorted_labels[:-1]])
    seg_id = jnp.cumsum(seg_start.astype(jnp.int32)) - 1
    first_in_seg = jax.ops.segment_min(order, seg_id, num_segments=n)
    j0 = jnp.zeros((n,), jnp.int32).at[order].set(first_in_seg[seg_id])
    tgt_sum = jnp.sum(reps_c.astype(jnp.float32) * reps_c[j0].astype(jnp.float32))

    # Pad N to an aligned multiple (keeps (8,128)-aligned blocks, pipelining, megacore split;
    # padding granularity grows with N so compute waste stays small).
    pad_to = 128 if n <= 1024 else (256 if n <= 4096 else 512)
    n_pad = (-(-n // pad_to)) * pad_to
    tm, tn = _choose_tiles(n_pad, d)
    grid_m, grid_n = n_pad // tm, n_pad // tn

    pad_rows = n_pad - n
    reps_p = jnp.pad(reps_c, ((0, pad_rows), (0, 0)))
    lab_p = jnp.pad(labels, (0, pad_rows))
    lab_col = lab_p.reshape(n_pad, 1)
    lab_row = lab_p.reshape(1, n_pad)

    kernel = functools.partial(_ntxent_lse_kernel, batch_size=batch_size,
                               tm=tm, tn=tn, n_valid=n, n_pad=n_pad)

    block_sums = pl.pallas_call(
        kernel,
        out_shape=jax.ShapeDtypeStruct((grid_m * 8, 128), jnp.float32),
        grid_spec=pltpu.PrefetchScalarGridSpec(
            num_scalar_prefetch=0,
            grid=(grid_m, grid_n),
            in_specs=[
                pl.BlockSpec((tm, 1), lambda i, j: (i, 0)),      # row labels (column vector)
                pl.BlockSpec((1, n_pad), lambda i, j: (0, 0)),   # column labels, VMEM-resident
                pl.BlockSpec((tm, d), lambda i, j: (i, 0)),      # row block of reps
                pl.BlockSpec((tn, d), lambda i, j: (j, 0)),      # column block of reps
            ],
            out_specs=pl.BlockSpec((8, 128), lambda i, j: (i, 0)),
            scratch_shapes=[
                pltpu.VMEM((tm, 1), jnp.float32),   # running max
                pltpu.VMEM((tm, 1), jnp.float32),   # running sum of exp
            ]),
        compiler_params=pltpu.CompilerParams(
            dimension_semantics=("parallel", "arbitrary"),
            vmem_limit_bytes=48 * 1024 * 1024),   # fits v7x's 64 MiB physical; ample on v5e/v6e
        cost_estimate=pl.CostEstimate(
            flops=2 * n_pad * n_pad * d,
            transcendentals=n_pad * n_pad,
            bytes_accessed=(grid_m + 1) * n_pad * d * 2),
    )(lab_col, lab_row, reps_p, reps_p)

    lse_sum = jnp.sum(block_sums)
    return (lse_sum - tgt_sum) / n


def _reference_loss(zis, zjs, lis, ljs, batch_size, temperature, use_cosine):
    """Direct numpy port of the torch forward (boolean masking + view), for validation."""
    reps = np.concatenate([np.asarray(zjs), np.asarray(zis)], 0).astype(np.float64)
    labels = np.concatenate([np.asarray(lis), np.asarray(ljs)], 0).astype(np.float64)
    N = 2 * batch_size
    if use_cosine:
        nrm = np.linalg.norm(reps, axis=-1, keepdims=True)
        sim = (reps @ reps.T) / np.maximum(nrm @ nrm.T, 1e-8)
    else:
        sim = reps @ reps.T
    same = labels[:, None] == labels[None, :]
    diag = np.eye(N)
    l1 = np.eye(N, k=-batch_size)
    l2 = np.eye(N, k=batch_size)
    struct_mask = (1 - (diag + l1 + l2)).astype(bool)
    negmask = struct_mask & (~same)
    positives = sim[same].reshape(N, -1)
    negatives = sim[negmask].reshape(N, -1)
    logits = np.concatenate([positives, negatives], axis=1) / temperature
    m = logits.max(-1, keepdims=True)
    lse = m[:, 0] + np.log(np.exp(logits - m).sum(-1))
    loss = np.sum(lse - logits[:, 0])
    return loss / N


if __name__ == "__main__":
    batch_size = 4
    hidden = 32
    temperature = 0.5
    use_cosine = True

    key = jax.random.PRNGKey(0)
    k1, k2 = jax.random.split(key)
    zis = jax.random.normal(k1, (batch_size, hidden), dtype=jnp.float32)
    zjs = jax.random.normal(k2, (batch_size, hidden), dtype=jnp.float32)
    # balanced class labels (required for the original .view(2B, -1) to be well-defined)
    lis = jnp.array([0, 0, 1, 1], dtype=jnp.int32)
    ljs = jnp.array([0, 0, 1, 1], dtype=jnp.int32)

    # jit the whole thing so concat / normalization / bf16 cast fuse with the kernel's inputs.
    loss_fn = jax.jit(functools.partial(
        ntxent_loss_class, batch_size=batch_size, temperature=temperature,
        use_cosine_similarity=use_cosine))
    loss = jax.block_until_ready(loss_fn(zis, zjs, lis, ljs))

    ref = _reference_loss(zis, zjs, lis, ljs, batch_size, temperature, use_cosine)
    # bf16 MXU operands -> slightly looser tolerance than a pure fp32 path
    assert np.allclose(np.asarray(loss), ref, atol=3e-2, rtol=3e-2), (float(loss), float(ref))
    print("KERNEL_OK")
</pallas_src>

<mosaic_0001>
module attributes {stable_mosaic.version = 11 : i64} {
  func.func @_ntxent_lse_kernel(%arg0: i32, %arg1: i32, %arg2: memref<128x1xi32, #tpu.memory_space<vmem>>, %arg3: memref<1x128xi32, #tpu.memory_space<vmem>>, %arg4: memref<128x32xbf16, #tpu.memory_space<vmem>>, %arg5: memref<128x32xbf16, #tpu.memory_space<vmem>>, %arg6: memref<8x128xf32, #tpu.memory_space<vmem>>, %arg7: memref<128x1xf32, #tpu.memory_space<vmem>>, %arg8: memref<128x1xf32, #tpu.memory_space<vmem>>) attributes {dimension_semantics = [#tpu.dimension_semantics<parallel>, #tpu.dimension_semantics<arbitrary>], iteration_bounds = array<i64: 1, 1>, scalar_prefetch = 0 : i64, scratch_operands = 2 : i64, tpu.core_type = #tpu.core_type<tc>, window_params = [{transform_indices = @transform_0, window_bounds = array<i64: 128, 1>}, {pipeline_mode = #tpu.pipeline_mode<synchronous>, transform_indices = @transform_1, window_bounds = array<i64: 1, 128>}, {transform_indices = @transform_2, window_bounds = array<i64: 128, 32>}, {transform_indices = @transform_3, window_bounds = array<i64: 128, 32>}, {transform_indices = @transform_4, window_bounds = array<i64: 8, 128>}]} {
    %c0_i32 = arith.constant 0 : i32
    %0 = arith.cmpi eq, %arg1, %c0_i32 : i32
    %1 = arith.extui %0 : i1 to i32
    %c0_i32_0 = arith.constant 0 : i32
    %2 = arith.cmpi ne, %1, %c0_i32_0 : i32
    scf.if %2 {
      %cst_24 = arith.constant -1.000000e+30 : f32
      %60 = vector.broadcast %cst_24 : f32 to vector<128x1xf32>
      %c0_25 = arith.constant 0 : index
      %c0_26 = arith.constant 0 : index
      %61 = vector.load %arg7[%c0_25, %c0_26] : memref<128x1xf32, #tpu.memory_space<vmem>>, vector<128x1xf32>
      tpu.vector_store %arg7[%c0_25, %c0_26], %60 {strides = array<i32>} : memref<128x1xf32, #tpu.memory_space<vmem>>, vector<128x1xf32>,
      %cst_27 = arith.constant 0.000000e+00 : f32
      %62 = vector.broadcast %cst_27 : f32 to vector<128x1xf32>
      %c0_28 = arith.constant 0 : index
      %c0_29 = arith.constant 0 : index
      %63 = vector.load %arg8[%c0_28, %c0_29] : memref<128x1xf32, #tpu.memory_space<vmem>>, vector<128x1xf32>
      tpu.vector_store %arg8[%c0_28, %c0_29], %62 {strides = array<i32>} : memref<128x1xf32, #tpu.memory_space<vmem>>, vector<128x1xf32>,
    } else {
    }
    %c0 = arith.constant 0 : index
    %c0_1 = arith.constant 0 : index
    %3 = vector.load %arg4[%c0, %c0_1] : memref<128x32xbf16, #tpu.memory_space<vmem>>, vector<128x32xbf16>
    %c0_2 = arith.constant 0 : index
    %c0_3 = arith.constant 0 : index
    %4 = vector.load %arg5[%c0_2, %c0_3] : memref<128x32xbf16, #tpu.memory_space<vmem>>, vector<128x32xbf16>
    %cst = arith.constant dense<0.000000e+00> : vector<128x128xf32>
    %5 = tpu.matmul %3, %4, %cst {dimension_numbers = #tpu.dot_dimension_numbers<[1], [1], [0], [0], [0, 0, 1, 0], [], []>} : vector<128x32xbf16>, vector<128x32xbf16>, vector<128x128xf32> -> vector<128x128xf32>
    %c128_i32 = arith.constant 128 : i32
    %6 = arith.muli %arg0, %c128_i32 : i32
    %7 = tpu.iota {dimensions = array<i32: 0>} : vector<128x1xi32>
    %8 = vector.broadcast %6 : i32 to vector<128x1xi32>
    %9 = arith.addi %8, %7 : vector<128x1xi32>
    %c128_i32_4 = arith.constant 128 : i32
    %10 = arith.muli %arg1, %c128_i32_4 : i32
    %11 = tpu.iota {dimensions = array<i32: 1>} : vector<1x128xi32>
    %12 = vector.broadcast %10 : i32 to vector<1x128xi32>
    %13 = arith.addi %12, %11 : vector<1x128xi32>
    %14 = vector.broadcast %9 : vector<128x1xi32> to vector<128x128xi32>
    %15 = vector.broadcast %13 : vector<1x128xi32> to vector<128x128xi32>
    %16 = arith.subi %14, %15 : vector<128x128xi32>
    %c0_i32_5 = arith.constant 0 : i32
    %17 = vector.broadcast %c0_i32_5 : i32 to vector<128x128xi32>
    %18 = arith.cmpi eq, %16, %17 : vector<128x128xi32>
    %c4_i32 = arith.constant 4 : i32
    %19 = vector.broadcast %c4_i32 : i32 to vector<128x128xi32>
    %20 = arith.cmpi eq, %16, %19 : vector<128x128xi32>
    %21 = arith.ori %18, %20 : vector<128x128xi1>
    %c-4_i32 = arith.constant -4 : i32
    %22 = vector.broadcast %c-4_i32 : i32 to vector<128x128xi32>
    %23 = arith.cmpi eq, %16, %22 : vector<128x128xi32>
    %24 = arith.ori %21, %23 : vector<128x128xi1>
    %c128_i32_6 = arith.constant 128 : i32
    %25 = arith.muli %arg1, %c128_i32_6 : i32
    %26 = tpu.assume_multiple %25, 128 : i32
    %c0_7 = arith.constant 0 : index
    %27 = arith.index_cast %26 : i32 to index
    %28 = vector.load %arg3[%c0_7, %27] : memref<1x128xi32, #tpu.memory_space<vmem>>, vector<1x128xi32>
    %c0_8 = arith.constant 0 : index
    %c0_9 = arith.constant 0 : index
    %29 = vector.load %arg2[%c0_8, %c0_9] : memref<128x1xi32, #tpu.memory_space<vmem>>, vector<128x1xi32>
    %30 = vector.broadcast %29 : vector<128x1xi32> to vector<128x128xi32>
    %31 = vector.broadcast %28 : vector<1x128xi32> to vector<128x128xi32>
    %32 = arith.cmpi eq, %30, %31 : vector<128x128xi32>
    %cst_10 = arith.constant dense<true> : vector<128x128xi1>
    %33 = arith.xori %24, %cst_10 : vector<128x128xi1>
    %34 = arith.ori %32, %33 : vector<128x128xi1>
    %c8_i32 = arith.constant 8 : i32
    %35 = vector.broadcast %c8_i32 : i32 to vector<1x128xi32>
    %36 = arith.cmpi slt, %13, %35 : vector<1x128xi32>
    %37 = vector.broadcast %36 : vector<1x128xi1> to vector<128x128xi1>
    %38 = arith.andi %34, %37 : vector<128x128xi1>
    %cst_11 = arith.constant -1.000000e+30 : f32
    %39 = vector.broadcast %cst_11 : f32 to vector<128x128xf32>
    %40 = arith.select %38, %5, %39 : vector<128x128xi1>, vector<128x128xf32>
    %c0_12 = arith.constant 0 : index
    %c0_13 = arith.constant 0 : index
    %41 = vector.load %arg7[%c0_12, %c0_13] : memref<128x1xf32, #tpu.memory_space<vmem>>, vector<128x1xf32>
    %cst_14 = arith.constant dense<0xFF800000> : vector<128xf32>
    %42 = vector.multi_reduction <maximumf>, %40, %cst_14 [1] : vector<128x128xf32> to vector<128xf32>
    %43 = vector.shape_cast %42 : vector<128xf32> to vector<128x1xf32>
    %44 = arith.maximumf %41, %43 : vector<128x1xf32>
    %45 = vector.broadcast %44 : vector<128x1xf32> to vector<128x128xf32>
    %46 = arith.subf %40, %45 : vector<128x128xf32>
    %47 = math.exp %46 : vector<128x128xf32>
    %48 = arith.subf %41, %44 : vector<128x1xf32>
    %49 = math.exp %48 : vector<128x1xf32>
    %c0_15 = arith.constant 0 : index
    %c0_16 = arith.constant 0 : index
    %50 = vector.load %arg8[%c0_15, %c0_16] : memref<128x1xf32, #tpu.memory_space<vmem>>, vector<128x1xf32>
    %51 = arith.mulf %49, %50 : vector<128x1xf32>
    %cst_17 = arith.constant dense<0.000000e+00> : vector<128xf32>
    %52 = vector.multi_reduction <add>, %47, %cst_17 [1] : vector<128x128xf32> to vector<128xf32>
    %53 = vector.shape_cast %52 : vector<128xf32> to vector<128x1xf32>
    %54 = arith.addf %51, %53 : vector<128x1xf32>
    %c0_18 = arith.constant 0 : index
    %c0_19 = arith.constant 0 : index
    %55 = vector.load %arg8[%c0_18, %c0_19] : memref<128x1xf32, #tpu.memory_space<vmem>>, vector<128x1xf32>
    tpu.vector_store %arg8[%c0_18, %c0_19], %54 {strides = array<i32>} : memref<128x1xf32, #tpu.memory_space<vmem>>, vector<128x1xf32>,
    %c0_20 = arith.constant 0 : index
    %c0_21 = arith.constant 0 : index
    %56 = vector.load %arg7[%c0_20, %c0_21] : memref<128x1xf32, #tpu.memory_space<vmem>>, vector<128x1xf32>
    tpu.vector_store %arg7[%c0_20, %c0_21], %44 {strides = array<i32>} : memref<128x1xf32, #tpu.memory_space<vmem>>, vector<128x1xf32>,
    %c0_i32_22 = arith.constant 0 : i32
    %57 = arith.cmpi eq, %arg1, %c0_i32_22 : i32
    %58 = arith.extui %57 : i1 to i32
    %c0_i32_23 = arith.constant 0 : i32
    %59 = arith.cmpi ne, %58, %c0_i32_23 : i32
    scf.if %59 {
      %c0_24 = arith.constant 0 : index
      %c0_25 = arith.constant 0 : index
      %60 = vector.load %arg7[%c0_24, %c0_25] : memref<128x1xf32, #tpu.memory_space<vmem>>, vector<128x1xf32>
      %c0_26 = arith.constant 0 : index
      %c0_27 = arith.constant 0 : index
      %61 = vector.load %arg8[%c0_26, %c0_27] : memref<128x1xf32, #tpu.memory_space<vmem>>, vector<128x1xf32>
      %62 = math.log %61 : vector<128x1xf32>
      %63 = arith.addf %60, %62 : vector<128x1xf32>
      %c8_i32_28 = arith.constant 8 : i32
      %64 = vector.broadcast %c8_i32_28 : i32 to vector<128x1xi32>
      %65 = arith.cmpi slt, %9, %64 : vector<128x1xi32>
      %cst_29 = arith.constant 0.000000e+00 : f32
      %66 = vector.broadcast %cst_29 : f32 to vector<128x1xf32>
      %67 = arith.select %65, %63, %66 : vector<128x1xi1>, vector<128x1xf32>
      %68 = vector.shape_cast %67 : vector<128x1xf32> to vector<1x128x1xf32>
      %cst_30 = arith.constant dense<0.000000e+00> : vector<1xf32>
      %69 = vector.multi_reduction <add>, %68, %cst_30 [1, 2] : vector<1x128x1xf32> to vector<1xf32>
      %70 = vector.shape_cast %69 : vector<1xf32> to vector<1x1x1xf32>
      %71 = vector.extract %70[0, 0, 0] : f32 from vector<1x1x1xf32>
      %72 = tpu.iota {dimensions = array<i32: 0>} : vector<8x128xi32>
      %73 = tpu.iota {dimensions = array<i32: 1>} : vector<8x128xi32>
      %c0_i32_31 = arith.constant 0 : i32
      %74 = vector.broadcast %c0_i32_31 : i32 to vector<8x128xi32>
      %75 = arith.cmpi eq, %72, %74 : vector<8x128xi32>
      %c0_i32_32 = arith.constant 0 : i32
      %76 = vector.broadcast %c0_i32_32 : i32 to vector<8x128xi32>
      %77 = arith.cmpi eq, %73, %76 : vector<8x128xi32>
      %78 = arith.andi %75, %77 : vector<8x128xi1>
      %cst_33 = arith.constant 0.000000e+00 : f32
      %79 = vector.broadcast %71 : f32 to vector<8x128xf32>
      %80 = vector.broadcast %cst_33 : f32 to vector<8x128xf32>
      %81 = arith.select %78, %79, %80 : vector<8x128xi1>, vector<8x128xf32>
      %c0_34 = arith.constant 0 : index
      %c0_35 = arith.constant 0 : index
      %82 = vector.load %arg6[%c0_34, %c0_35] : memref<8x128xf32, #tpu.memory_space<vmem>>, vector<8x128xf32>
      tpu.vector_store %arg6[%c0_34, %c0_35], %81 {strides = array<i32>} : memref<8x128xf32, #tpu.memory_space<vmem>>, vector<8x128xf32>,
    } else {
    }
    return
  }
  func.func @transform_0(%arg0: i32, %arg1: i32) -> (i32, i32) {
    %c0_i32 = arith.constant 0 : i32
    %c0_i32_0 = arith.constant 0 : i32
    return %arg0, %c0_i32 : i32, i32
  }
  func.func @transform_1(%arg0: i32, %arg1: i32) -> (i32, i32) {
    %c0_i32 = arith.constant 0 : i32
    %c0_i32_0 = arith.constant 0 : i32
    %c0_i32_1 = arith.constant 0 : i32
    return %c0_i32, %c0_i32_0 : i32, i32
  }
  func.func @transform_2(%arg0: i32, %arg1: i32) -> (i32, i32) {
    %c0_i32 = arith.constant 0 : i32
    %c0_i32_0 = arith.constant 0 : i32
    return %arg0, %c0_i32 : i32, i32
  }
  func.func @transform_3(%arg0: i32, %arg1: i32) -> (i32, i32) {
    %c0_i32 = arith.constant 0 : i32
    %c0_i32_0 = arith.constant 0 : i32
    return %arg1, %c0_i32 : i32, i32
  }
  func.func @transform_4(%arg0: i32, %arg1: i32) -> (i32, i32) {
    %c0_i32 = arith.constant 0 : i32
    %c0_i32_0 = arith.constant 0 : i32
    return %arg0, %c0_i32 : i32, i32
  }
}

</mosaic_0001>

<bundles_post_ra>
// kernel: ntxent_loss_class.1
= control target key start
LH: loop header
LB: loop body
LE: loop exit
PB: predicated region body
PF: predicated region fallthrough
CT: control target
= control target key end

     0   :  { %vm167_vm0 = vcmask 261120   ;;  %v1318_v1 = vmov 0   ;;  %vm1981_vm1 = vcmask 7168   ;;  %v1319_v35 = vmov -1e+30   ;;  %s1976_s3 = inlined_call_operand.vmem [shape: bf16[128,32], index: 3, kind: input, shape index: {}, may-alias: {2,3}]   ;;  %s1977_s2 = inlined_call_operand.vmem [shape: bf16[128,32], index: 2, kind: input, shape index: {}, may-alias: {2,3}]   ;;  %s1978_s0 = inlined_call_operand.vmem [shape: s32[128,1], index: 0, kind: input, shape index: {}]   ;;  %s1979_s1 = inlined_call_operand.vmem [shape: s32[1,128], index: 1, kind: input, shape index: {}]   ;;  %s1980_s4 = inlined_call_operand.vmem [shape: f32[8,128], index: 4, kind: output, shape index: {}]  }
   0x1   :  { %v1236_v0 = vld [vmem:[%s1976_s3] sm:$0xff]   ;;  %1235 = vset.pattern.permute.xlu1 %v1318_v1  ;;  %1234 = vset.pattern.permute.xlu0 %v1318_v1  ;;  %v1237_v2 = vld [vmem:[%s1976_s3 + $0x8] sm:$0xff]   ;;  %v1238_v4 = vld [vmem:[%s1976_s3 + $0x10] sm:$0xff]   ;;  %23 = vst.msk [vmem:[#allocation2] sm:$0xff] %vm1981_vm1, %v1319_v35  ;;  %v314_v36 = vlaneseq  ;;  %vm1983_vm12 = vmmov 1   ;;  %v1321_v58 = vmov 0.0  }
   0x2   :  { %1212 = vmatprep.subr.msk.bf16.mxu0 %vm167_vm0, %v1236_v0  ;;  %v193_v3 = vsel %vm167_vm0, %v1236_v0, 0  ;;  %1213 = vmatprep.subr.msk.bf16.mxu1 %vm167_vm0, %v1236_v0  ;;  %v196_v5 = vsel %vm167_vm0, %v1237_v2, 0  ;;  %v1244_v6 = vld [vmem:[%s1977_s2] sm:$0xff]   ;;  %v454_v7 = vld [vmem:[%s1978_s0 + $0x8] sm:$0xff]  ;;  %v455_v9 = vld [vmem:[%s1978_s0 + $0x10] sm:$0xff]  ;;  %v199_v11 = vsel %vm167_vm0, %v1238_v4, 0 }
   0x3   :  { %1165 = vmatpush3.bf16.xpose.msra.mxu0 %v193_v3  ;;  %1204 = vmatpush3.bf16.xpose.msra.mxu1 %v193_v3  ;;  %v453_v8 = vld [vmem:[%s1978_s0] sm:$0xff]  ;;  %v1239_v12 = vld [vmem:[%s1976_s3 + $0x18] sm:$0xff]   ;;  %v1241_v17 = vld [vmem:[%s1976_s3 + $0x28] sm:$0xff]   ;;  %24 = vst.msk [vmem:[#allocation2 + $0x8] sm:$0xff] %vm1981_vm1, %v1319_v35  ;;  %v1473_v37 = vshrl.u32 %v314_v36, 7  ;;  %v1475_v38 = vand.u32 127, %v314_v36 }
   0x4   :  { %1214 = vmatprep.subr.msk.bf16.mxu0 %vm167_vm0, %v1237_v2  ;;  %1215 = vmatprep.subr.msk.bf16.mxu1 %vm167_vm0, %v1237_v2  ;;  %v1246_v10 = vld [vmem:[%s1977_s2 + $0x20] sm:$0xff]   ;;  %v456_v13 = vld [vmem:[%s1978_s0 + $0x18] sm:$0xff]  ;;  %v202_v14 = vsel %vm167_vm0, %v1239_v12, 0  ;;  %v208_v18 = vsel %vm167_vm0, %v1241_v17, 0  ;;  %v1242_v19 = vld [vmem:[%s1976_s3 + $0x30] sm:$0xff]   ;;  %25 = vst.msk [vmem:[#allocation2 + $0x10] sm:$0xff] %vm1981_vm1, %v1319_v35 }
   0x5   :  { %1180 = vmatprep.mubr.msk.bf16.mxu0 %vm167_vm0, %v1244_v6  ;;  %473 = vperm.xlu1 %1235, %v454_v7   ;;  %v1240_v15 = vld [vmem:[%s1976_s3 + $0x20] sm:$0xff]   ;;  %v211_v20 = vsel %vm167_vm0, %v1242_v19, 0  ;;  %v1243_v21 = vld [vmem:[%s1976_s3 + $0x38] sm:$0xff]   ;;  %v1245_v23 = vld [vmem:[%s1977_s2 + $0x8] sm:$0xff]   ;;  %26 = vst.msk [vmem:[#allocation2 + $0x18] sm:$0xff] %vm1981_vm1, %v1319_v35  ;;  %v316_v39 = vadd.s32 8, %v1473_v37  ;;  %v353_v40 = vsub.s32 %v1473_v37, %v1475_v38 }
   0x6   :  { %470 = vperm.xlu0 %1234, %v453_v8   ;;  %1188 = vmatprep.mubr.msk.bf16.mxu1 %vm167_vm0, %v1246_v10  ;;  %v205_v16 = vsel %vm167_vm0, %v1240_v15, 0  ;;  %v214_v22 = vsel %vm167_vm0, %v1243_v21, 0  ;;  %v1248_v24 = vld [vmem:[%s1977_s2 + $0x10] sm:$0xff]   ;;  %v1247_v25 = vld [vmem:[%s1977_s2 + $0x28] sm:$0xff]   ;;  %v1249_v26 = vld [vmem:[%s1977_s2 + $0x18] sm:$0xff]   ;;  %27 = vst.msk [vmem:[#allocation2 + $0x20] sm:$0xff] %vm1981_vm1, %v1319_v35 }
   0x7   :  { %v457_v27 = vld [vmem:[%s1978_s0 + $0x20] sm:$0xff]  ;;  %v458_v28 = vld [vmem:[%s1978_s0 + $0x28] sm:$0xff]  ;;  %v459_v29 = vld [vmem:[%s1978_s0 + $0x30] sm:$0xff]  ;;  %28 = vst.msk [vmem:[#allocation2 + $0x28] sm:$0xff] %vm1981_vm1, %v1319_v35  ;;  %v354_v41 = vsub.s32 %v316_v39, %v1475_v38  ;;  %vm369_vm2 = vcmp.eq.s32.totalorder %v353_v40, 0  ;;  %vm385_vm3 = vcmp.eq.s32.totalorder %v353_v40, 4 }
   0x8   :  { %v460_v30 = vld [vmem:[%s1978_s0 + $0x38] sm:$0xff]  ;;  %v461_v31 = vld [vmem:[%s1978_s0 + $0x40] sm:$0xff]  ;;  %v463_v32 = vld [vmem:[%s1978_s0 + $0x50] sm:$0xff]  ;;  %29 = vst.msk [vmem:[#allocation2 + $0x30] sm:$0xff] %vm1981_vm1, %v1319_v35  ;;  %vm417_vm7 = vcmp.eq.s32.totalorder %v353_v40, 4294967292  ;;  %v317_v53 = vadd.s32 16, %v1473_v37 }
   0x9   :  { %476 = vperm.xlu1 %1235, %v455_v9   ;;  %v1250_v33 = vld [vmem:[%s1977_s2 + $0x30] sm:$0xff]   ;;  %v1251_v34 = vld [vmem:[%s1977_s2 + $0x38] sm:$0xff]   ;;  %30 = vst.msk [vmem:[#allocation2 + $0x38] sm:$0xff] %vm1981_vm1, %v1319_v35  ;;  %31 = vst.msk [vmem:[#allocation2 + $0x40] sm:$0xff] %vm1981_vm1, %v1319_v35  ;;  %vm370_vm4 = vcmp.eq.s32.totalorder %v354_v41, 0  ;;  %vm386_vm5 = vcmp.eq.s32.totalorder %v354_v41, 4 }
   0xa   :  { %32 = vst.msk [vmem:[#allocation2 + $0x48] sm:$0xff] %vm1981_vm1, %v1319_v35  ;;  %33 = vst.msk [vmem:[#allocation2 + $0x50] sm:$0xff] %vm1981_vm1, %v1319_v35  ;;  %vm418_vm9 = vcmp.eq.s32.totalorder %v354_v41, 4294967292  ;;  %v1484_v42 = vld [vmem:[%s1979_s1] ss:$0 sm:$0xff]  ;;  %v462_v51 = vld [vmem:[%s1978_s0 + $0x48] sm:$0xff]  ;;  %v355_v60 = vsub.s32 %v317_v53, %v1475_v38 }
   0xb   :  { %1167 = vmatpush3.bf16.xpose.msra.mxu0 %v196_v5  ;;  %1205 = vmatpush3.bf16.xpose.msra.mxu1 %v196_v5  ;;  %34 = vst.msk [vmem:[#allocation2 + $0x58] sm:$0xff] %vm1981_vm1, %v1319_v35  ;;  %35 = vst.msk [vmem:[#allocation2 + $0x60] sm:$0xff] %vm1981_vm1, %v1319_v35  ;;  %v318_v56 = vadd.s32 24, %v1473_v37  ;;  %v319_v63 = vadd.s32 32, %v1473_v37  ;;  %v320_v10 = vadd.s32 40, %v1473_v37  ;;  %v464_v41 = vld [vmem:[%s1978_s0 + $0x58] sm:$0xff] }
   0xc   :  { %1216 = vmatprep.subr.msk.bf16.mxu0 %vm167_vm0, %v1238_v4  ;;  %1217 = vmatprep.subr.msk.bf16.mxu1 %vm167_vm0, %v1238_v4  ;;  %36 = vst.msk [vmem:[#allocation2 + $0x68] sm:$0xff] %vm1981_vm1, %v1319_v35  ;;  %37 = vst.msk [vmem:[#allocation2 + $0x70] sm:$0xff] %vm1981_vm1, %v1319_v35  ;;  %v321_v4 = vadd.s32 48, %v1473_v37  ;;  %v324_v53 = vadd.s32 72, %v1473_v37 }
   0xd   :  { %479 = vperm.xlu1 %1235, %v456_v13   ;;  %38 = vst.msk [vmem:[#allocation2 + $0x78] sm:$0xff] %vm1981_vm1, %v1319_v35  ;;  %vm401_vm6 = vmor %vm369_vm2, %vm385_vm3  ;;  %vm1982_vm3 = vcmp.lt.s32.totalorder %v1475_v38, 8  ;;  %v356_v61 = vsub.s32 %v318_v56, %v1475_v38  ;;  %v357_v1 = vsub.s32 %v319_v63, %v1475_v38  ;;  %v358_v13 = vsub.s32 %v320_v10, %v1475_v38  ;;  %v1650_v35 = vld [vmem:[#allocation2] sm:$0xff]  ;;  %v1685_v56 = vld [vmem:[#allocation2 + $0x10] sm:$0xff] }
   0xe   :  { %vm402_vm8 = vmor %vm370_vm4, %vm386_vm5  ;;  %39 = vst.msk [vmem:[#allocation3] sm:$0xff] %vm1981_vm1, %v1321_v58  ;;  %v359_v6 = vsub.s32 %v321_v4, %v1475_v38 }
   0xf   :  { %vm433_vm10 = vmor %vm401_vm6, %vm417_vm7  ;;  %40 = vst.msk [vmem:[#allocation3 + $0x8] sm:$0xff] %vm1981_vm1, %v1321_v58  ;;  %vm371_vm7 = vcmp.eq.s32.totalorder %v355_v60, 0 }
  0x10   :  { %vm434_vm11 = vmor %vm402_vm8, %vm418_vm9  ;;  %41 = vst.msk [vmem:[#allocation3 + $0x10] sm:$0xff] %vm1981_vm1, %v1321_v58  ;;  %vm387_vm8 = vcmp.eq.s32.totalorder %v355_v60, 4  ;;  %vm372_vm9 = vcmp.eq.s32.totalorder %v356_v61, 0 }
  0x11   :  { %482 = vperm.xlu1 %1235, %v457_v27   ;;  %vm537_vm13 = vmxor %vm433_vm10, %vm1983_vm12  ;;  %42 = vst.msk [vmem:[#allocation3 + $0x18] sm:$0xff] %vm1981_vm1, %v1321_v58  ;;  %vm388_vm10 = vcmp.eq.s32.totalorder %v356_v61, 4  ;;  %v1729_v10 = vld [vmem:[#allocation2 + $0x50] sm:$0xff] }
  0x12   :  { %vm538_vm15 = vmxor %vm434_vm11, %vm1983_vm12  ;;  %43 = vst.msk [vmem:[#allocation3 + $0x20] sm:$0xff] %vm1981_vm1, %v1321_v58 }
  0x13   :  { %1169 = vmatpush3.bf16.xpose.msra.mxu0 %v199_v11  ;;  %1206 = vmatpush3.bf16.xpose.msra.mxu1 %v199_v11  ;;  %44 = vst.msk [vmem:[#allocation3 + $0x28] sm:$0xff] %vm1981_vm1, %v1321_v58  ;;  %45 = vst.msk [vmem:[#allocation3 + $0x30] sm:$0xff] %vm1981_vm1, %v1321_v58  ;;  %v323_v11 = vadd.s32 64, %v1473_v37 }
  0x14   :  { %1218 = vmatprep.subr.msk.bf16.mxu0 %vm167_vm0, %v1239_v12  ;;  %1219 = vmatprep.subr.msk.bf16.mxu1 %vm167_vm0, %v1239_v12  ;;  %46 = vst.msk [vmem:[#allocation3 + $0x38] sm:$0xff] %vm1981_vm1, %v1321_v58  ;;  %47 = vst.msk [vmem:[#allocation3 + $0x40] sm:$0xff] %vm1981_vm1, %v1321_v58 }
  0x15   :  { %485 = vperm.xlu1 %1235, %v458_v28   ;;  %48 = vst.msk [vmem:[#allocation3 + $0x48] sm:$0xff] %vm1981_vm1, %v1321_v58  ;;  %49 = vst.msk [vmem:[#allocation3 + $0x50] sm:$0xff] %vm1981_vm1, %v1321_v58 }
  0x16   :  { %50 = vst.msk [vmem:[#allocation3 + $0x58] sm:$0xff] %vm1981_vm1, %v1321_v58  ;;  %51 = vst.msk [vmem:[#allocation3 + $0x60] sm:$0xff] %vm1981_vm1, %v1321_v58 }
  0x17   :  { %52 = vst.msk [vmem:[#allocation3 + $0x68] sm:$0xff] %vm1981_vm1, %v1321_v58  ;;  %53 = vst.msk [vmem:[#allocation3 + $0x70] sm:$0xff] %vm1981_vm1, %v1321_v58 }
  0x18   :  { %54 = vst.msk [vmem:[#allocation3 + $0x78] sm:$0xff] %vm1981_vm1, %v1321_v58  ;;  %vm403_vm11 = vmor %vm371_vm7, %vm387_vm8 }
  0x19   :  { %488 = vperm.xlu1 %1235, %v459_v29  }
  0x1b   :  { %1171 = vmatpush3.bf16.xpose.msra.mxu0 %v202_v14  ;;  %1207 = vmatpush3.bf16.xpose.msra.mxu1 %v202_v14  ;;  %v361_v14 = vsub.s32 %v323_v11, %v1475_v38 }
  0x1c   :  { %1220 = vmatprep.subr.msk.bf16.mxu0 %vm167_vm0, %v1240_v15  ;;  %1221 = vmatprep.subr.msk.bf16.mxu1 %vm167_vm0, %v1240_v15  ;;  %v325_v15 = vadd.s32 80, %v1473_v37 }
  0x1d   :  { %491 = vperm.xlu1 %1235, %v460_v30  }
  0x21   :  { %494 = vperm.xlu1 %1235, %v461_v31  }
  0x23   :  { %1173 = vmatpush3.bf16.xpose.msra.mxu0 %v205_v16  ;;  %1208 = vmatpush3.bf16.xpose.msra.mxu1 %v205_v16  ;;  %v322_v16 = vadd.s32 56, %v1473_v37 }
  0x24   :  { %1222 = vmatprep.subr.msk.bf16.mxu0 %vm167_vm0, %v1241_v17  ;;  %1223 = vmatprep.subr.msk.bf16.mxu1 %vm167_vm0, %v1241_v17 }
  0x25   :  { %500 = vperm.xlu1 %1235, %v463_v32  }
  0x2b   :  { %1175 = vmatpush3.bf16.xpose.msra.mxu0 %v208_v18  ;;  %1209 = vmatpush3.bf16.xpose.msra.mxu1 %v208_v18 }
  0x2c   :  { %1224 = vmatprep.subr.msk.bf16.mxu0 %vm167_vm0, %v1242_v19  ;;  %1225 = vmatprep.subr.msk.bf16.mxu1 %vm167_vm0, %v1242_v19 }
  0x33   :  { %1177 = vmatpush3.bf16.xpose.msra.mxu0 %v211_v20  ;;  %1210 = vmatpush3.bf16.xpose.msra.mxu1 %v211_v20  ;;  %v1994_v20 = vmov 0 }
  0x34   :  { %1226 = vmatprep.subr.msk.bf16.mxu0 %vm167_vm0, %v1243_v21  ;;  %1227 = vmatprep.subr.msk.bf16.mxu1 %vm167_vm0, %v1243_v21  ;;  %v363_v21 = vsub.s32 %v325_v15, %v1475_v38 }
  0x3b   :  { %1179 = vmatpush3.bf16.xpose.msra.mxu0 %v214_v22  ;;  %1211 = vmatpush3.bf16.xpose.msra.mxu1 %v214_v22  ;;  %v1997_v22 = vmov 0 }
  0x42   :  { %1181 = vmatmul.mubr.msk.bf16.vlgmr.msra.gmra.mrb[0].mxu0 %vm167_vm0, %v1245_v23  ;;  %1189 = vmatmul.mubr.msk.bf16.vlgmr.msra.gmra.mrb[0].mxu1 %vm167_vm0, %v1247_v25  ;;  %v360_v23 = vsub.s32 %v322_v16, %v1475_v38  ;;  %v1999_v25 = vmov 0  ;;  %v328_v16 = vadd.s32 104, %v1473_v37 }
  0x43   :  { %1184 = vmatprep.mubr.msk.bf16.mxu0 %vm167_vm0, %v1248_v24  ;;  %1192 = vmatprep.mubr.msk.bf16.mxu1 %vm167_vm0, %v1250_v33 }
  0x44   :  { %v366_v17 = vsub.s32 %v328_v16, %v1475_v38 }
  0x4a   :  { %1185 = vmatmul.mubr.msk.bf16.gmra.mrb[4].mxu0 %vm167_vm0, %v1249_v26  ;;  %1193 = vmatmul.mubr.msk.bf16.gmra.mrb[4].mxu1 %vm167_vm0, %v1251_v34 }
  0x84   :  { %v474_v44 = vpop.permute.xlu1 %473 }
  0x85   :  { %v471_v43 = vpop.permute.xlu0 %470  ;;  %vm522_vm0 = vcmp.eq.s32.totalorder %v474_v44, %v1484_v42  ;;  %v466_v44 = vld [vmem:[%s1978_s0 + $0x68] sm:$0xff] }
  0x86   :  { %vm521_vm14 = vcmp.eq.s32.totalorder %v471_v43, %v1484_v42  ;;  %vm554_vm4 = vmor %vm522_vm0, %vm538_vm15  ;;  %vm420_vm15 = vcmp.eq.s32.totalorder %v356_v61, 4294967292  ;;  %v465_v43 = vld [vmem:[%s1978_s0 + $0x60] sm:$0xff] }
  0x87   :  { %vm553_vm2 = vmor %vm521_vm14, %vm537_vm13  ;;  %vm419_vm13 = vcmp.eq.s32.totalorder %v355_v60, 4294967292  ;;  %v1690_v61 = vld [vmem:[#allocation2 + $0x18] sm:$0xff] }
  0x88   :  { %vm572_vm5 = vmand %vm553_vm2, %vm1982_vm3  ;;  %v477_v54 = vpop.permute.xlu1 %476 }
  0x89   :  { %vm573_vm6 = vmand %vm554_vm4, %vm1982_vm3  ;;  %vm373_vm4 = vcmp.eq.s32.totalorder %v357_v1, 0  ;;  %vm523_vm7 = vcmp.eq.s32.totalorder %v477_v54, %v1484_v42  ;;  %v362_v54 = vsub.s32 %v324_v53, %v1475_v38 }
  0x8a   :  { %vm404_vm14 = vmor %vm372_vm9, %vm388_vm10 }
  0x8b   :  { %vm435_vm0 = vmor %vm403_vm11, %vm419_vm13  ;;  %vm421_vm11 = vcmp.eq.s32.totalorder %v357_v1, 4294967292 }
  0x8c   :  { %v480_v62 = vpop.permute.xlu1 %479  ;;  %vm436_vm2 = vmor %vm404_vm14, %vm420_vm15  ;;  %vm375_vm14 = vcmp.eq.s32.totalorder %v359_v6, 0  ;;  %vm391_vm15 = vcmp.eq.s32.totalorder %v359_v6, 4 }
  0x8d   :  { %vm540_vm8 = vmxor %vm436_vm2, %vm1983_vm12  ;;  %vm524_vm9 = vcmp.eq.s32.totalorder %v480_v62, %v1484_v42 }
  0x8e   :  { %vm1551_vm1 = vmor %vm524_vm9, %vm540_vm8 }
  0x8f   :  { %vm407_vm3 = vmor %vm375_vm14, %vm391_vm15  ;;  %vm374_vm15 = vcmp.eq.s32.totalorder %v358_v13, 0 }
  0x90   :  { %v483_v0 = vpop.permute.xlu1 %482 }
  0x94   :  { %v1537_v2 = vpop.permute.xlu1 %485 }
  0x98   :  { %v489_v7 = vpop.permute.xlu1 %488 }
  0x9c   :  { %v1557_v12 = vpop.permute.xlu1 %491 }
  0xa0   :  { %v495_v18 = vpop.permute.xlu1 %494 }
  0xa4   :  { %v501_v27 = vpop.permute.xlu1 %500 }
 0x115   :  { %v1493_v45 = vpop.f32.mrb[0].mxu0  ;;  %v1507_v52 = vpop.f32.mrb[0].mxu1 }
 0x116   :  { %v250_v46 = vpop.f32.mrb[1].mxu0  ;;  %v1510_v55 = vpop.f32.mrb[1].mxu1 }
 0x117   :  { %v1497_v47 = vpop.f32.mrb[2].mxu0  ;;  %v1499_v48 = vsel %vm572_vm5, %v250_v46, -1e+30  ;;  %v1513_v57 = vpop.f32.mrb[2].mxu1  ;;  %vm389_vm5 = vcmp.eq.s32.totalorder %v357_v1, 4 }
 0x118   :  { %v253_v49 = vpop.f32.mrb[3].mxu0  ;;  %620 = vmax.xlane.f32.xlu0 %v1499_v48  ;;  %v1531_v59 = vpop.f32.mrb[3].mxu1  ;;  %vm405_vm10 = vmor %vm373_vm4, %vm389_vm5 }
 0x119   :  { %v1502_v50 = vsel %vm573_vm6, %v253_v49, -1e+30  ;;  %vm539_vm6 = vmxor %vm435_vm0, %vm1983_vm12  ;;  %vm423_vm0 = vcmp.eq.s32.totalorder %v359_v6, 4294967292  ;;  %v1718_v6 = vld [vmem:[#allocation2 + $0x40] sm:$0xff] }
 0x11a   :  { %vm1547_vm13 = vmor %vm523_vm7, %vm539_vm6  ;;  %vm525_vm6 = vcmp.eq.s32.totalorder %v483_v0, %v1484_v42  ;;  %vm1990_vm7 = vcmp.lt.s32.totalorder %v1475_v38, 8  ;;  %v1698_v0 = vld [vmem:[#allocation2 + $0x20] sm:$0xff] }
 0x11b   :  { %vm437_vm2 = vmor %vm405_vm10, %vm421_vm11  ;;  %vm527_vm10 = vcmp.eq.s32.totalorder %v489_v7, %v1484_v42 }
 0x11c   :  { %vm439_vm4 = vmor %vm407_vm3, %vm423_vm0  ;;  %vm390_vm0 = vcmp.eq.s32.totalorder %v358_v13, 4 }
 0x11d   :  { %v1539_v3 = vpop.f32.mrb[4].mxu0  ;;  %vm541_vm5 = vmxor %vm437_vm2, %vm1983_vm12  ;;  %vm393_vm2 = vcmp.eq.s32.totalorder %v361_v14, 4 }
 0x11e   :  { %v266_v5 = vpop.f32.mrb[5].mxu0  ;;  %vm574_vm8 = vmand %vm1547_vm13, %vm1990_vm7  ;;  %vm377_vm13 = vcmp.eq.s32.totalorder %v361_v14, 0 }
 0x11f   :  { %vm543_vm9 = vmxor %vm439_vm4, %vm1983_vm12  ;;  %v1580_v19 = vsel %vm574_vm8, %v1493_v45, -1e+30  ;;  %vm529_vm8 = vcmp.eq.s32.totalorder %v495_v18, %v1484_v42  ;;  %v1187_v31 = vpop.f32.mrb[6].mxu0  ;;  %v1669_v45 = vpop.f32.mrb[4].mxu1  ;;  %v329_v18 = vadd.s32 112, %v1473_v37 }
 0x120   :  { %vm557_vm3 = vmor %vm525_vm6, %vm541_vm5  ;;  %vm425_vm5 = vcmp.eq.s32.totalorder %v361_v14, 4294967292  ;;  %v269_v32 = vpop.f32.mrb[7].mxu0  ;;  %v1671_v46 = vpop.f32.mrb[5].mxu1 }
 0x121   :  { %vm1991_vm11 = vmmov %vm1990_vm7  ;;  %v1676_v49 = vpop.f32.mrb[6].mxu1 }
 0x122   :  { %vm1575_vm14 = vmand %vm1551_vm1, %vm1991_vm11 }
 0x123   :  { %vm1582_vm4 = vmor %vm527_vm10, %vm543_vm9  ;;  %v1599_v24 = vsel %vm1575_vm14, %v1497_v47, -1e+30  ;;  %vm376_vm14 = vcmp.eq.s32.totalorder %v360_v23, 0  ;;  %v467_v47 = vld [vmem:[%s1978_s0 + $0x70] sm:$0xff] }
 0x124   :  { %v1995_v20 = vsel %vm1582_vm4, 4294967295, %v1994_v20  ;;  %vm1996_vm1 = vmmov %vm1990_vm7  ;;  %vm379_vm4 = vcmp.eq.s32.totalorder %v363_v21, 0 }
 0x125   :  { %vm576_vm6 = vmand %vm557_vm3, %vm1996_vm1  ;;  %vm395_vm1 = vcmp.eq.s32.totalorder %v363_v21, 4 }
 0x126   :  { %vm1590_vm7 = vmor %vm374_vm15, %vm390_vm0  ;;  %vm427_vm15 = vcmp.eq.s32.totalorder %v363_v21, 4294967292  ;;  %v1607_v26 = vsel %vm576_vm6, %v266_v5, -1e+30  ;;  %vm2001_vm0 = vcmp.lt.s32.totalorder %v1475_v38, 8  ;;  %vm424_vm6 = vcmp.eq.s32.totalorder %v360_v23, 4294967292 }
 0x127   :  { %v1998_v22 = vsel %vm1590_vm7, 4294967295, %v1997_v22  ;;  %vm409_vm11 = vmor %vm377_vm13, %vm393_vm2  ;;  %vm2002_vm13 = vnez %v1995_v20  ;;  %vm422_vm7 = vcmp.eq.s32.totalorder %v358_v13, 4294967292  ;;  %v327_v13 = vadd.s32 96, %v1473_v37 }
 0x128   :  { %vm441_vm9 = vmor %vm409_vm11, %vm425_vm5  ;;  %vm392_vm5 = vcmp.eq.s32.totalorder %v360_v23, 4  ;;  %v367_v20 = vsub.s32 %v329_v18, %v1475_v38  ;;  %v330_v21 = vadd.s32 120, %v1473_v37  ;;  %v1850_v18 = vld [vmem:[#allocation2 + $0x58] sm:$0xff] }
 0x129   :  { %vm545_vm10 = vmxor %vm441_vm9, %vm1983_vm12  ;;  %v365_v15 = vsub.s32 %v327_v13, %v1475_v38 }
 0x12a   :  { %vm1603_vm3 = vmor %vm529_vm8, %vm545_vm10  ;;  %vm531_vm10 = vcmp.eq.s32.totalorder %v501_v27, %v1484_v42 }
 0x12b   :  { %v2000_v25 = vsel %vm1603_vm3, 4294967295, %v1999_v25  ;;  %vm578_vm2 = vmand %vm2002_vm13, %vm2001_vm0 }
 0x12c   :  { %vm411_vm11 = vmor %vm379_vm4, %vm395_vm1  ;;  %v1617_v28 = vsel %vm578_vm2, %v1539_v3, -1e+30  ;;  %vm2003_vm13 = vnez %v2000_v25  ;;  %v1708_v3 = vld [vmem:[#allocation2 + $0x30] sm:$0xff]  ;;  %v368_v25 = vsub.s32 %v330_v21, %v1475_v38 }
 0x12d   :  { %vm443_vm9 = vmor %vm411_vm11, %vm427_vm15  ;;  %vm2004_vm15 = vnez %v1998_v22 }
 0x12e   :  { %497 = vperm.xlu0 %1234, %v462_v51   ;;  %vm547_vm8 = vmxor %vm443_vm9, %vm1983_vm12  ;;  %v1678_v51 = vpop.f32.mrb[7].mxu1 }
 0x12f   :  { %vm408_vm3 = vmor %vm376_vm14, %vm392_vm5 }
 0x130   :  { %vm580_vm1 = vmand %vm2003_vm13, %vm2001_vm0 }
 0x131   :  { %vm563_vm4 = vmor %vm531_vm10, %vm547_vm8  ;;  %v1627_v29 = vsel %vm580_vm1, %v1510_v55, -1e+30 }
 0x132   :  { %vm438_vm11 = vmor %vm2004_vm15, %vm422_vm7  ;;  %vm528_vm7 = vcmp.eq.s32.totalorder %v1557_v12, %v1484_v42  ;;  %vm2008_vm15 = vcmask 7168  }
 0x133   :  { %vm440_vm9 = vmor %vm408_vm3, %vm424_vm6 }
 0x134   :  { %vm2005_vm14 = vmmov %vm2001_vm0  ;;  %vm526_vm0 = vcmp.eq.s32.totalorder %v1537_v2, %v1484_v42 }
 0x135   :  { %vm582_vm2 = vmand %vm563_vm4, %vm2005_vm14 }
 0x136   :  { %vm542_vm5 = vmxor %vm438_vm11, %vm1983_vm12  ;;  %v1639_v30 = vsel %vm582_vm2, %v1507_v52, -1e+30  ;;  %v468_v52 = vld [vmem:[%s1978_s0 + $0x78] sm:$0xff]  ;;  %vm378_vm11 = vcmp.eq.s32.totalorder %v362_v54, 0  ;;  %vm426_vm2 = vcmp.eq.s32.totalorder %v362_v54, 4294967292 }
 0x137   :  { %vm544_vm8 = vmxor %vm440_vm9, %vm1983_vm12  ;;  %vm394_vm9 = vcmp.eq.s32.totalorder %v362_v54, 4  ;;  %v1812_v54 = vld [vmem:[#allocation2 + $0x28] sm:$0xff] }
 0x138   :  { %vm558_vm3 = vmor %vm526_vm0, %vm542_vm5 }
 0x139   :  { %vm560_vm10 = vmor %vm528_vm7, %vm544_vm8 }
 0x13a   :  { %vm2006_vm6 = vmmov %vm2005_vm14 }
 0x13b   :  { %vm577_vm13 = vmand %vm558_vm3, %vm2006_vm6 }
 0x13c   :  { %v1644_v33 = vsel %vm577_vm13, %v269_v32, -1e+30  ;;  %vm2007_vm1 = vmmov %vm2006_vm6 }
 0x13d   :  { %vm579_vm4 = vmand %vm560_vm10, %vm2007_vm1 }
 0x13e   :  { %v1648_v34 = vsel %vm579_vm4, %v1187_v31, -1e+30  ;;  %vm410_vm14 = vmor %vm378_vm11, %vm394_vm9  ;;  %v2016_v31 = vmov 0 }
 0x13f   :  { %vm2009_vm5 = vmmov %vm2008_vm15 }
 0x140   :  { %vm442_vm0 = vmor %vm410_vm14, %vm426_vm2  ;;  %vm381_vm2 = vcmp.eq.s32.totalorder %v365_v15, 0 }
 0x141   :  { %vm2010_vm8 = vmmov %vm2009_vm5 }
 0x142   :  { %vm546_vm7 = vmxor %vm442_vm0, %vm1983_vm12 }
 0x143   :  { %vm2011_vm6 = vmmov %vm2009_vm5 }
 0x144   :  { %vm2012_vm13 = vmmov %vm2007_vm1 }
 0x145   :  { %vm2013_vm4 = vmmov %vm2009_vm5 }
 0x146   :  { %vm2015_vm11 = vmmov %vm2013_vm4 }
 0x14d   :  { %624 = vmax.xlane.f32.xlu0 %v1580_v19 }
 0x151   :  { %626 = vmax.xlane.f32.xlu0 %v1599_v24 }
 0x155   :  { %628 = vmax.xlane.f32.xlu0 %v1607_v26 }
 0x159   :  { %632 = vmax.xlane.f32.xlu0 %v1617_v28 }
 0x15d   :  { %636 = vmax.xlane.f32.xlu0 %v1627_v29 }
 0x161   :  { %640 = vmax.xlane.f32.xlu0 %v1639_v30 }
 0x1a5   :  { %v621_v36 = vpop.xlane.xlu0 %620 }
 0x1a6   :  { %v1653_v39 = vmax.f32 %v1650_v35, %v621_v36  ;;  %v2018_v36 = vmov 0 }
 0x1a8   :  { %v796_v40 = vsub.f32 %v1650_v35, %v1653_v39  ;;  %941 = vst.msk [vmem:[#allocation2] sm:$0xff] %vm2008_vm15, %v1653_v39  ;;  %670 = vperm.xlu1 %1235, %v1653_v39   ;;  %vm2014_vm15 = vmmov %vm2013_vm4  ;;  %v1860_v35 = vld [vmem:[#allocation2 + $0x68] sm:$0xff] }
 0x1ac   :  { %503 = vperm.xlu1 %1235, %v464_v41  }
 0x1ad   :  { %v498_v55 = vpop.permute.xlu0 %497 }
 0x1ae   :  { %vm530_vm3 = vcmp.eq.s32.totalorder %v498_v55, %v1484_v42 }
 0x1af   :  { %vm562_vm10 = vmor %vm530_vm3, %vm546_vm7  ;;  %vm429_vm3 = vcmp.eq.s32.totalorder %v365_v15, 4294967292  ;;  %v960_v13 = vld [vmem:[#allocation2] sm:$0xff] }
 0x1b0   :  { %506 = vperm.xlu1 %1235, %v465_v43   ;;  %vm581_vm1 = vmand %vm562_vm10, %vm2012_vm13  ;;  %vm382_vm10 = vcmp.eq.s32.totalorder %v366_v17, 0 }
 0x1b1   :  { %v1723_v8 = vsel %vm581_vm1, %v1531_v59, -1e+30  ;;  %v326_v59 = vadd.s32 88, %v1473_v37 }
 0x1b3   :  { %v364_v14 = vsub.s32 %v326_v59, %v1475_v38  ;;  %v1832_v59 = vld [vmem:[#allocation2 + $0x48] sm:$0xff] }
 0x1b4   :  { %509 = vperm.xlu1 %1235, %v466_v44  }
 0x1b5   :  { %vm380_vm9 = vcmp.eq.s32.totalorder %v364_v14, 0  ;;  %vm396_vm14 = vcmp.eq.s32.totalorder %v364_v14, 4 }
 0x1b6   :  { %vm412_vm0 = vmor %vm380_vm9, %vm396_vm14  ;;  %vm383_vm9 = vcmp.eq.s32.totalorder %v367_v20, 0  ;;  %vm399_vm14 = vcmp.eq.s32.totalorder %v367_v20, 4 }
 0x1b8   :  { %512 = vperm.xlu1 %1235, %v467_v47  }
 0x1bc   :  { %515 = vperm.xlu1 %1235, %v468_v52  }
 0x1da   :  { %v625_v58 = vpop.xlane.xlu0 %624 }
 0x1db   :  { %v1688_v60 = vmax.f32 %v1685_v56, %v625_v58 }
 0x1dd   :  { %943 = vst.msk [vmem:[#allocation2 + $0x10] sm:$0xff] %vm2009_vm5, %v1688_v60  ;;  %vm397_vm5 = vcmp.eq.s32.totalorder %v365_v15, 4 }
 0x1de   :  { %v627_v62 = vpop.xlane.xlu0 %626  ;;  %vm413_vm7 = vmor %vm381_vm2, %vm397_vm5 }
 0x1df   :  { %v1695_v63 = vmax.f32 %v1690_v61, %v627_v62  ;;  %vm445_vm1 = vmor %vm413_vm7, %vm429_vm3  ;;  %vm431_vm7 = vcmp.eq.s32.totalorder %v367_v20, 4294967292 }
 0x1e0   :  { %622 = vmax.xlane.f32.xlu1 %v1502_v50  ;;  %vm1751_vm2 = vmxor %vm445_vm1, %vm1983_vm12 }
 0x1e1   :  { %944 = vst.msk [vmem:[#allocation2 + $0x18] sm:$0xff] %vm2010_vm8, %v1695_v63  ;;  %vm428_vm8 = vcmp.eq.s32.totalorder %v364_v14, 4294967292  ;;  %v2017_v31 = vsel %vm1751_vm2, 4294967295, %v2016_v31 }
 0x1e2   :  { %v629_v1 = vpop.xlane.xlu0 %628  ;;  %vm444_vm13 = vmor %vm412_vm0, %vm428_vm8 }
 0x1e3   :  { %v1705_v2 = vmax.f32 %v1698_v0, %v629_v1  ;;  %vm415_vm8 = vmor %vm383_vm9, %vm399_vm14  ;;  %v1822_v1 = vld [vmem:[#allocation2 + $0x38] sm:$0xff] }
 0x1e4   :  { %630 = vmax.xlane.f32.xlu1 %v1644_v33 }
 0x1e5   :  { %945 = vst.msk [vmem:[#allocation2 + $0x20] sm:$0xff] %vm2011_vm6, %v1705_v2  ;;  %vm398_vm6 = vcmp.eq.s32.totalorder %v366_v17, 4 }
 0x1e6   :  { %v633_v4 = vpop.xlane.xlu0 %632 }
 0x1e7   :  { %v1713_v5 = vmax.f32 %v1708_v3, %v633_v4 }
 0x1e8   :  { %634 = vmax.xlane.f32.xlu1 %v1648_v34 }
 0x1e9   :  { %947 = vst.msk [vmem:[#allocation2 + $0x30] sm:$0xff] %vm2013_vm4, %v1713_v5  ;;  %vm414_vm4 = vmor %vm382_vm10, %vm398_vm6  ;;  %vm384_vm10 = vcmp.eq.s32.totalorder %v368_v25, 0  ;;  %vm400_vm6 = vcmp.eq.s32.totalorder %v368_v25, 4 }
 0x1ea   :  { %v637_v7 = vpop.xlane.xlu0 %636 }
 0x1eb   :  { %v1726_v9 = vmax.f32 %v1718_v6, %v637_v7 }
 0x1ec   :  { %638 = vmax.xlane.f32.xlu1 %v1723_v8 }
 0x1ed   :  { %949 = vst.msk [vmem:[#allocation2 + $0x40] sm:$0xff] %vm2014_vm15, %v1726_v9  ;;  %vm430_vm15 = vcmp.eq.s32.totalorder %v366_v17, 4294967292  ;;  %v812_v17 = vmul.f32 1.442695, %v796_v40 }
 0x1ee   :  { %v641_v11 = vpop.xlane.xlu0 %640  ;;  %vm1755_vm5 = vmor %vm414_vm4, %vm430_vm15  ;;  %vm432_vm15 = vcmp.eq.s32.totalorder %v368_v25, 4294967292  ;;  %v844_v25 = vld [vmem:[#allocation3] sm:$0xff] }
 0x1ef   :  { %v1734_v12 = vmax.f32 %v1729_v10, %v641_v11  ;;  %v2019_v36 = vsel %vm1755_vm5, 4294967295, %v2018_v36  ;;  %vm416_vm4 = vmor %vm384_vm10, %vm400_vm6  ;;  %vm2021_vm5 = vmmov 1  }
 0x1f0   :  { %vm2022_vm9 = vnez %v2019_v36  ;;  %v1865_v36 = vld [vmem:[#allocation2 + $0x60] sm:$0xff] }
 0x1f1   :  { %951 = vst.msk [vmem:[#allocation2 + $0x50] sm:$0xff] %vm2015_vm11, %v1734_v12  ;;  %vm548_vm11 = vmxor %vm444_vm13, %vm1983_vm12  ;;  %vm2020_vm13 = vcmp.lt.s32.totalorder %v1475_v38, 8 }
 0x1f2   :  { %vm447_vm12 = vmor %vm415_vm8, %vm431_vm7  ;;  %vm2024_vm7 = vcmp.lt.s32.totalorder %v1475_v38, 8 }
 0x1f3   :  { %vm551_vm14 = vmxor %vm447_vm12, %vm2021_vm5 }
 0x1f4   :  { %vm2025_vm6 = vmmov %vm2024_vm7 }
 0x227   :  { %v671_v22 = vpop.permute.xlu1 %670 }
 0x228   :  { %v748_v23 = vsub.f32 %v1499_v48, %v671_v22 }
 0x22a   :  { %v764_v27 = vmul.f32 1.442695, %v748_v23 }
 0x22b   :  { %v504_v32 = vpop.permute.xlu1 %503 }
 0x22c   :  { %1252 = vpow2.f32 %v764_v27  ;;  %vm532_vm0 = vcmp.eq.s32.totalorder %v504_v32, %v1484_v42 }
 0x22d   :  { %vm564_vm3 = vmor %vm532_vm0, %vm548_vm11  ;;  %1254 = vpow2.f32 %v812_v17 }
 0x22e   :  { %vm583_vm1 = vmand %vm564_vm3, %vm2020_vm13  ;;  %vm2023_vm3 = vnez %v2017_v31 }
 0x22f   :  { %v507_v48 = vpop.permute.xlu1 %506  ;;  %v1763_v41 = vsel %vm583_vm1, %v1513_v57, -1e+30  ;;  %vm550_vm11 = vmxor %vm2022_vm9, %vm2021_vm5 }
 0x230   :  { %642 = vmax.xlane.f32.xlu1 %v1763_v41  ;;  %vm533_vm2 = vcmp.eq.s32.totalorder %v507_v48, %v1484_v42  ;;  %vm448_vm0 = vmor %vm416_vm4, %vm432_vm15 }
 0x231   :  { %vm565_vm13 = vmor %vm533_vm2, %vm2023_vm3 }
 0x232   :  { %vm584_vm12 = vmand %vm565_vm13, %vm2025_vm6 }
 0x233   :  { %v510_v43 = vpop.permute.xlu1 %509  ;;  %v1784_v52 = vsel %vm584_vm12, %v1671_v46, -1e+30  ;;  %vm552_vm15 = vmxor %vm448_vm0, %vm2021_vm5  ;;  %vm2028_vm5 = vcmask 7168  }
 0x234   :  { %vm534_vm1 = vcmp.eq.s32.totalorder %v510_v43, %v1484_v42  ;;  %vm2026_vm9 = vmmov %vm2025_vm6 }
 0x235   :  { %vm566_vm8 = vmor %vm534_vm1, %vm550_vm11 }
 0x236   :  { %v1253_v57 = vpop.eup %1252  ;;  %vm585_vm10 = vmand %vm566_vm8, %vm2024_vm7 }
 0x237   :  { %876 = vadd.xlane.f32.xlu0 %v1253_v57  ;;  %v513_v44 = vpop.permute.xlu1 %512  ;;  %v1777_v47 = vsel %vm585_vm10, %v1678_v51, -1e+30  ;;  %vm2027_vm13 = vmmov %vm2025_vm6  ;;  %v1255_v22 = vpop.eup %1254 }
 0x238   :  { %vm535_vm4 = vcmp.eq.s32.totalorder %v513_v44, %v1484_v42  ;;  %646 = vmax.xlane.f32.xlu1 %v1777_v47  ;;  %vm2029_vm0 = vmmov %vm2028_vm5  ;;  %v860_v27 = vmul.f32 %v1255_v22, %v844_v25  ;;  %v1876_v44 = vld [vmem:[#allocation2 + $0x70] sm:$0xff] }
 0x239   :  { %vm567_vm2 = vmor %vm535_vm4, %vm551_vm14 }
 0x23a   :  { %vm586_vm11 = vmand %vm567_vm2, %vm2026_vm9 }
 0x23b   :  { %644 = vmax.xlane.f32.xlu0 %v1784_v52  ;;  %v516_v53 = vpop.permute.xlu1 %515  ;;  %v1792_v51 = vsel %vm586_vm11, %v1669_v45, -1e+30  ;;  %vm2030_vm8 = vmmov %vm2029_vm0 }
 0x23c   :  { %vm536_vm3 = vcmp.eq.s32.totalorder %v516_v53, %v1484_v42  ;;  %v1807_v42 = vld [vmem:[#allocation2 + $0x8] sm:$0xff]  ;;  %vm2031_vm7 = vmmov %vm2029_vm0 }
 0x23d   :  { %vm568_vm1 = vmor %vm536_vm3, %vm552_vm15 }
 0x23e   :  { %vm587_vm14 = vmand %vm568_vm1, %vm2027_vm13 }
 0x23f   :  { %648 = vmax.xlane.f32.xlu0 %v1792_v51  ;;  %v1798_v46 = vsel %vm587_vm14, %v1676_v49, -1e+30  ;;  %vm2032_vm10 = vmmov %vm2029_vm0 }
 0x240   :  { %650 = vmax.xlane.f32.xlu1 %v1798_v46  ;;  %vm2033_vm6 = vmmov %vm2029_vm0 }
 0x241   :  { %vm2034_vm12 = vmmov %vm2029_vm0 }
 0x242   :  { %vm2035_vm4 = vmmov %vm2029_vm0 }
 0x243   :  { %vm2037_vm2 = vmmov %vm2029_vm0 }
 0x244   :  { %vm2038_vm15 = vmmov %vm2029_vm0 }
 0x245   :  { %vm2039_vm9 = vmmov %vm2029_vm0 }
 0x246   :  { %vm2042_vm11 = vmmov %vm2029_vm0 }
 0x247   :  { %vm2044_vm3 = vmmov %vm2029_vm0 }
 0x248   :  { %vm2046_vm1 = vmmov %vm2029_vm0 }
 0x249   :  { %vm2047_vm13 = vmmov %vm2029_vm0 }
 0x24a   :  { %vm2048_vm14 = vmmov %vm2029_vm0 }
 0x251   :  { %680 = vperm.xlu1 %1235, %v1688_v60  }
 0x255   :  { %685 = vperm.xlu1 %1235, %v1695_v63  }
 0x259   :  { %690 = vperm.xlu1 %1235, %v1705_v2  }
 0x25d   :  { %700 = vperm.xlu1 %1235, %v1713_v5  }
 0x261   :  { %710 = vperm.xlu1 %1235, %v1726_v9  }
 0x265   :  { %720 = vperm.xlu1 %1235, %v1734_v12  }
 0x26d   :  { %v623_v45 = vpop.xlane.xlu1 %622 }
 0x26e   :  { %v1810_v49 = vmax.f32 %v1807_v42, %v623_v45  ;;  %v1883_v45 = vld [vmem:[#allocation2 + $0x78] sm:$0xff] }
 0x270   :  { %942 = vst.msk [vmem:[#allocation2 + $0x8] sm:$0xff] %vm2028_vm5, %v1810_v49  ;;  %675 = vperm.xlu0 %1234, %v1810_v49   ;;  %vm2049_vm5 = vmmov %vm2029_vm0 }
 0x271   :  { %v631_v58 = vpop.xlane.xlu1 %630 }
 0x272   :  { %v1820_v62 = vmax.f32 %v1812_v54, %v631_v58 }
 0x274   :  { %946 = vst.msk [vmem:[#allocation2 + $0x28] sm:$0xff] %vm2029_vm0, %v1820_v62  ;;  %695 = vperm.xlu0 %1234, %v1820_v62  }
 0x275   :  { %v635_v7 = vpop.xlane.xlu1 %634 }
 0x276   :  { %v1830_v11 = vmax.f32 %v1822_v1, %v635_v7 }
 0x278   :  { %948 = vst.msk [vmem:[#allocation2 + $0x38] sm:$0xff] %vm2030_vm8, %v1830_v11  ;;  %705 = vperm.xlu0 %1234, %v1830_v11   ;;  %vm2050_vm8 = vmmov %vm2029_vm0 }
 0x279   :  { %v639_v14 = vpop.xlane.xlu1 %638 }
 0x27a   :  { %v1840_v15 = vmax.f32 %v1832_v59, %v639_v14 }
 0x27c   :  { %950 = vst.msk [vmem:[#allocation2 + $0x48] sm:$0xff] %vm2031_vm7, %v1840_v15  ;;  %715 = vperm.xlu0 %1234, %v1840_v15   ;;  %vm2051_vm7 = vmmov %vm2029_vm0 }
 0x2bd   :  { %v643_v20 = vpop.xlane.xlu1 %642 }
 0x2be   :  { %v1853_v21 = vmax.f32 %v1850_v18, %v643_v20 }
 0x2c0   :  { %952 = vst.msk [vmem:[#allocation2 + $0x58] sm:$0xff] %vm2032_vm10, %v1853_v21  ;;  %725 = vperm.xlu0 %1234, %v1853_v21   ;;  %vm2052_vm10 = vmmov %vm2029_vm0 }
 0x2c4   :  { %v877_v39 = vpop.xlane.xlu0 %876 }
 0x2c5   :  { %v908_v40 = vadd.f32 %v877_v39, %v860_v27  ;;  %v647_v31 = vpop.xlane.xlu1 %646 }
 0x2c6   :  { %v1863_v32 = vmax.f32 %v1860_v35, %v647_v31 }
 0x2c7   :  { %925 = vst.msk [vmem:[#allocation3] sm:$0xff] %vm2033_vm6, %v908_v40  ;;  %vm1112_vm6 = vcmp.eq.s32.totalorder %v1473_v37, 0 }
 0x2c8   :  { %954 = vst.msk [vmem:[#allocation2 + $0x68] sm:$0xff] %vm2034_vm12, %v1863_v32  ;;  %735 = vperm.xlu0 %1234, %v1863_v32   ;;  %v645_v43 = vpop.xlane.xlu0 %644  ;;  %vm1113_vm12 = vcmp.eq.s32.totalorder %v1475_v38, 0 }
 0x2c9   :  { %v1874_v57 = vmax.f32 %v1865_v36, %v645_v43 }
 0x2cb   :  { %953 = vst.msk [vmem:[#allocation2 + $0x60] sm:$0xff] %vm2035_vm4, %v1874_v57  ;;  %730 = vperm.xlu1 %1235, %v1874_v57   ;;  %vm1114_vm4 = vmand %vm1112_vm6, %vm1113_vm12  ;;  %v2055_v37 = vsub.f32 %v1865_v36, %v1874_v57  ;;  %v857_v36 = vld [vmem:[#allocation3 + $0x68] sm:$0xff] }
 0x2cc   :  { %v649_v58 = vpop.xlane.xlu0 %648 }
 0x2cd   :  { %v1886_v7 = vmax.f32 %v1876_v44, %v649_v58  ;;  %v651_v14 = vpop.xlane.xlu1 %650  ;;  %v836_v38 = vmul.f32 1.442695, %v2055_v37 }
 0x2ce   :  { %v1889_v17 = vmax.f32 %v1883_v45, %v651_v14  ;;  %v976_v39 = vld [vmem:[#allocation3] sm:$0xff] }
 0x2cf   :  { %955 = vst.msk [vmem:[#allocation2 + $0x70] sm:$0xff] %vm2037_vm2, %v1886_v7  ;;  %740 = vperm.xlu1 %1235, %v1886_v7   ;;  %1256 = vlog2.f32 %v976_v39  ;;  %vm2059_vm2 = vmmov %vm2029_vm0 }
 0x2d0   :  { %2036 = vst [vmem:[#allocation4_spill] sm:$0xff] %v1889_v17  ;;  %956 = vst.msk [vmem:[#allocation2 + $0x78] sm:$0xff] %vm2038_vm15, %v1889_v17  ;;  %745 = vperm.xlu0 %1234, %v1889_v17  }
 0x2d1   :  { %v681_v25 = vpop.permute.xlu1 %680  ;;  %vm2060_vm15 = vmmov %vm2029_vm0 }
 0x2d2   :  { %v750_v55 = vsub.f32 %v1580_v19, %v681_v25 }
 0x2d5   :  { %v686_v27 = vpop.permute.xlu1 %685 }
 0x2d9   :  { %v691_v40 = vpop.permute.xlu1 %690  ;;  %v1257_v58 = vpop.eup %1256 }
 0x2da   :  { %v752_v43 = vsub.f32 %v1607_v26, %v691_v40  ;;  %v993_v48 = vmul.f32 0.6931472, %v1257_v58 }
 0x2dc   :  { %v772_v20 = vmul.f32 1.442695, %v752_v43  ;;  %v1024_v4 = vadd.f32 %v993_v48, %v960_v13 }
 0x2dd   :  { %v701_v31 = vpop.permute.xlu1 %700 }
 0x2de   :  { %v754_v53 = vsub.f32 %v1617_v28, %v701_v31  ;;  %1258 = vpow2.f32 %v772_v20  ;;  %v1072_v28 = vsel %vm2039_vm9, %v1024_v4, 0.0  ;;  %v768_v31 = vmul.f32 1.442695, %v750_v55  ;;  %vm2061_vm9 = vmmov %vm2029_vm0 }
 0x2e0   :  { %v776_v23 = vmul.f32 1.442695, %v754_v53  ;;  %v751_v53 = vsub.f32 %v1599_v24, %v686_v27 }
 0x2e1   :  { %v711_v14 = vpop.permute.xlu1 %710 }
 0x2e2   :  { %v756_v22 = vsub.f32 %v1627_v29, %v711_v14  ;;  %1260 = vpow2.f32 %v776_v23  ;;  %v770_v23 = vmul.f32 1.442695, %v751_v53 }
 0x2e4   :  { %v780_v17 = vmul.f32 1.442695, %v756_v22 }
 0x2e5   :  { %v721_v16 = vpop.permute.xlu1 %720 }
 0x2e6   :  { %v758_v26 = vsub.f32 %v1639_v30, %v721_v16  ;;  %1262 = vpow2.f32 %v780_v17 }
 0x2e8   :  { %v784_v20 = vmul.f32 1.442695, %v758_v26  ;;  %v1259_v13 = vpop.eup %1258 }
 0x2ef   :  { %v676_v39 = vpop.permute.xlu0 %675 }
 0x2f0   :  { %v749_v40 = vsub.f32 %v1502_v50, %v676_v39  ;;  %v1261_v50 = vpop.eup %1260 }
 0x2f1   :  { %v1263_v16 = vpop.eup %1262 }
 0x2f2   :  { %v766_v43 = vmul.f32 1.442695, %v749_v40 }
 0x2f3   :  { %1103 = vadd.xlane.f32.xlu1 %v1072_v28  ;;  %v696_v29 = vpop.permute.xlu0 %695 }
 0x2f4   :  { %1264 = vpow2.f32 %v766_v43  ;;  %v753_v30 = vsub.f32 %v1644_v33, %v696_v29 }
 0x2f5   :  { %1266 = vpow2.f32 %v768_v31 }
 0x2f6   :  { %1268 = vpow2.f32 %v784_v20  ;;  %v774_v4 = vmul.f32 1.442695, %v753_v30 }
 0x2f7   :  { %884 = vadd.xlane.f32.xlu1 %v1259_v13  ;;  %v706_v19 = vpop.permute.xlu0 %705  ;;  %1270 = vpow2.f32 %v770_v23 }
 0x2f8   :  { %v755_v55 = vsub.f32 %v1648_v34, %v706_v19  ;;  %1272 = vpow2.f32 %v774_v4 }
 0x2fa   :  { %v778_v24 = vmul.f32 1.442695, %v755_v55 }
 0x2fb   :  { %888 = vadd.xlane.f32.xlu1 %v1261_v50  ;;  %v716_v48 = vpop.permute.xlu0 %715 }
 0x2fc   :  { %v757_v22 = vsub.f32 %v1723_v8, %v716_v48  ;;  %1274 = vpow2.f32 %v778_v24  ;;  %v800_v48 = vsub.f32 %v1698_v0, %v1705_v2  ;;  %v2040_v0 = vsub.f32 %v1807_v42, %v1810_v49  ;;  %v850_v42 = vld [vmem:[#allocation3 + $0x30] sm:$0xff] }
 0x2fe   :  { %v1265_v17 = vpop.eup %1264  ;;  %v782_v33 = vmul.f32 1.442695, %v757_v22  ;;  %v798_v22 = vsub.f32 %v1685_v56, %v1688_v60  ;;  %v814_v2 = vmul.f32 1.442695, %v2040_v0 }
 0x2ff   :  { %892 = vadd.xlane.f32.xlu1 %v1263_v16  ;;  %878 = vadd.xlane.f32.xlu0 %v1265_v17  ;;  %v1267_v25 = vpop.eup %1266  ;;  %v802_v17 = vsub.f32 %v1708_v3, %v1713_v5  ;;  %v799_v3 = vsub.f32 %v1690_v61, %v1695_v63  ;;  %v2041_v61 = vsub.f32 %v1812_v54, %v1820_v62 }
 0x300   :  { %v1269_v27 = vpop.eup %1268  ;;  %1276 = vpow2.f32 %v782_v33  ;;  %v816_v33 = vmul.f32 1.442695, %v798_v22  ;;  %v847_v22 = vld [vmem:[#allocation3 + $0x18] sm:$0xff] }
 0x301   :  { %v1271_v58 = vpop.eup %1270  ;;  %v824_v24 = vmul.f32 1.442695, %v802_v17  ;;  %v818_v60 = vmul.f32 1.442695, %v799_v3  ;;  %v822_v63 = vmul.f32 1.442695, %v2041_v61 }
 0x302   :  { %v1273_v14 = vpop.eup %1272 }
 0x303   :  { %896 = vadd.xlane.f32.xlu1 %v1269_v27  ;;  %880 = vadd.xlane.f32.xlu0 %v1267_v25  ;;  %v806_v27 = vsub.f32 %v1729_v10, %v1734_v12 }
 0x305   :  { %v832_v5 = vmul.f32 1.442695, %v806_v27 }
 0x306   :  { %v1275_v34 = vpop.eup %1274 }
 0x307   :  { %882 = vadd.xlane.f32.xlu0 %v1271_v58  ;;  %v848_v58 = vld [vmem:[#allocation3 + $0x20] sm:$0xff] }
 0x30a   :  { %v1277_v39 = vpop.eup %1276 }
 0x30b   :  { %886 = vadd.xlane.f32.xlu0 %v1273_v14 }
 0x30f   :  { %890 = vadd.xlane.f32.xlu0 %v1275_v34 }
 0x313   :  { %894 = vadd.xlane.f32.xlu0 %v1277_v39 }
 0x33f   :  { %v726_v26 = vpop.permute.xlu0 %725 }
 0x340   :  { %v759_v40 = vsub.f32 %v1763_v41, %v726_v26 }
 0x342   :  { %v786_v43 = vmul.f32 1.442695, %v759_v40 }
 0x344   :  { %1278 = vpow2.f32 %v786_v43 }
 0x347   :  { %v736_v8 = vpop.permute.xlu0 %735 }
 0x348   :  { %v761_v28 = vsub.f32 %v1777_v47, %v736_v8 }
 0x34a   :  { %v790_v31 = vmul.f32 1.442695, %v761_v28  ;;  %v731_v29 = vpop.permute.xlu1 %730 }
 0x34b   :  { %v760_v53 = vsub.f32 %v1784_v52, %v731_v29  ;;  %v845_v29 = vld [vmem:[#allocation3 + $0x8] sm:$0xff] }
 0x34c   :  { %1280 = vpow2.f32 %v790_v31  ;;  %v852_v31 = vld [vmem:[#allocation3 + $0x40] sm:$0xff] }
 0x34d   :  { %v788_v20 = vmul.f32 1.442695, %v760_v53 }
 0x34e   :  { %v1279_v13 = vpop.eup %1278  ;;  %v741_v19 = vpop.permute.xlu1 %740 }
 0x34f   :  { %1282 = vpow2.f32 %v788_v20  ;;  %v762_v23 = vsub.f32 %v1792_v51, %v741_v19  ;;  %898 = vadd.xlane.f32.xlu0 %v1279_v13  ;;  %v746_v30 = vpop.permute.xlu0 %745  ;;  %v820_v51 = vmul.f32 1.442695, %v800_v48  ;;  %v2043_v13 = vsub.f32 %v1822_v1, %v1830_v11 }
 0x350   :  { %v763_v41 = vsub.f32 %v1798_v46, %v746_v30  ;;  %v804_v46 = vsub.f32 %v1718_v6, %v1726_v9  ;;  %v2045_v48 = vsub.f32 %v1832_v59, %v1840_v15 }
 0x351   :  { %v792_v50 = vmul.f32 1.442695, %v762_v23  ;;  %v826_v19 = vmul.f32 1.442695, %v2043_v13 }
 0x352   :  { %v794_v4 = vmul.f32 1.442695, %v763_v41  ;;  %v828_v25 = vmul.f32 1.442695, %v804_v46  ;;  %v830_v1 = vmul.f32 1.442695, %v2045_v48 }
 0x353   :  { %1284 = vpow2.f32 %v792_v50 }
 0x354   :  { %1286 = vpow2.f32 %v794_v4 }
 0x355   :  { %1288 = vpow2.f32 %v820_v51 }
 0x356   :  { %v1281_v47 = vpop.eup %1280  ;;  %1290 = vpow2.f32 %v824_v24 }
 0x357   :  { %902 = vadd.xlane.f32.xlu0 %v1281_v47  ;;  %1292 = vpow2.f32 %v828_v25  ;;  %v854_v47 = vld [vmem:[#allocation3 + $0x50] sm:$0xff] }
 0x358   :  { %1294 = vpow2.f32 %v814_v2  ;;  %v849_v2 = vld [vmem:[#allocation3 + $0x28] sm:$0xff] }
 0x359   :  { %v1283_v55 = vpop.eup %1282  ;;  %1296 = vpow2.f32 %v816_v33 }
 0x35a   :  { %900 = vadd.xlane.f32.xlu1 %v1283_v55  ;;  %1298 = vpow2.f32 %v832_v5  ;;  %v846_v55 = vld [vmem:[#allocation3 + $0x10] sm:$0xff] }
 0x35b   :  { %1300 = vpow2.f32 %v818_v60 }
 0x35c   :  { %1302 = vpow2.f32 %v822_v63  ;;  %v2053_v63 = vsub.f32 %v1850_v18, %v1853_v21  ;;  %v2057_v18 = vld [vmem:[#allocation4_spill] sm:$0xff] }
 0x35d   :  { %v1285_v52 = vpop.eup %1284  ;;  %1304 = vpow2.f32 %v826_v19  ;;  %v2058_v21 = vsub.f32 %v1883_v45, %v2057_v18 }
 0x35e   :  { %v1287_v16 = vpop.eup %1286  ;;  %904 = vadd.xlane.f32.xlu1 %v1285_v52  ;;  %1306 = vpow2.f32 %v830_v1 }
 0x35f   :  { %906 = vadd.xlane.f32.xlu0 %v1287_v16  ;;  %v1289_v6 = vpop.eup %1288 }
 0x360   :  { %v864_v10 = vmul.f32 %v1289_v6, %v848_v58  ;;  %v1291_v12 = vpop.eup %1290 }
 0x361   :  { %v1293_v26 = vpop.eup %1292  ;;  %v866_v40 = vmul.f32 %v1291_v12, %v850_v42 }
 0x362   :  { %v1295_v8 = vpop.eup %1294  ;;  %v868_v54 = vmul.f32 %v1293_v26, %v852_v31  ;;  %v834_v26 = vmul.f32 1.442695, %v2053_v63  ;;  %v2056_v31 = vsub.f32 %v1876_v44, %v1886_v7 }
 0x363   :  { %v1297_v23 = vpop.eup %1296  ;;  %v861_v62 = vmul.f32 %v1295_v8, %v845_v29 }
 0x364   :  { %v1299_v41 = vpop.eup %1298  ;;  %v862_v51 = vmul.f32 %v1297_v23, %v846_v55  ;;  %1308 = vpow2.f32 %v834_v26  ;;  %v840_v29 = vmul.f32 1.442695, %v2056_v31  ;;  %v856_v23 = vld [vmem:[#allocation3 + $0x60] sm:$0xff] }
 0x365   :  { %v870_v11 = vmul.f32 %v1299_v41, %v854_v47  ;;  %v1301_v17 = vpop.eup %1300 }
 0x366   :  { %v863_v0 = vmul.f32 %v1301_v17, %v847_v22  ;;  %v1303_v59 = vpop.eup %1302 }
 0x367   :  { %v865_v3 = vmul.f32 %v1303_v59, %v849_v2  ;;  %v1305_v5 = vpop.eup %1304 }
 0x368   :  { %v1307_v60 = vpop.eup %1306 }
 0x36e   :  { %v1309_v8 = vpop.eup %1308 }
 0x380   :  { %v1104_v9 = vpop.xlane.xlu1 %1103 }
 0x381   :  { %v1105_v56 = vrot.slane %v1104_v9, 4 }
 0x383   :  { %v1106_v14 = vadd.f32 %v1105_v56, %v1104_v9  ;;  %v851_v9 = vld [vmem:[#allocation3 + $0x38] sm:$0xff] }
 0x384   :  { %v885_v34 = vpop.xlane.xlu1 %884  ;;  %v867_v56 = vmul.f32 %v1305_v5, %v851_v9 }
 0x385   :  { %v1107_v49 = vrot.slane %v1106_v14, 2  ;;  %v912_v39 = vadd.f32 %v885_v34, %v864_v10  ;;  %v853_v10 = vld [vmem:[#allocation3 + $0x48] sm:$0xff] }
 0x386   :  { %v869_v34 = vmul.f32 %v1307_v60, %v853_v10 }
 0x387   :  { %929 = vst.msk [vmem:[#allocation3 + $0x20] sm:$0xff] %vm2042_vm11, %v912_v39  ;;  %v1108_v43 = vadd.f32 %v1107_v49, %v1106_v14  ;;  %vm2062_vm11 = vmmov %vm2029_vm0 }
 0x388   :  { %v889_v28 = vpop.xlane.xlu1 %888 }
 0x389   :  { %v914_v53 = vadd.f32 %v889_v28, %v866_v40  ;;  %v1109_v20 = vrot.slane %v1108_v43, 1  ;;  %v2054_v40 = vsub.f32 %v1860_v35, %v1863_v32  ;;  %v855_v28 = vld [vmem:[#allocation3 + $0x58] sm:$0xff] }
 0x38b   :  { %931 = vst.msk [vmem:[#allocation3 + $0x30] sm:$0xff] %vm2044_vm3, %v914_v53  ;;  %v1110_v30 = vadd.f32 %v1109_v20, %v1108_v43  ;;  %v838_v43 = vmul.f32 1.442695, %v2054_v40  ;;  %v842_v53 = vmul.f32 1.442695, %v2058_v21  ;;  %v871_v20 = vmul.f32 %v1309_v8, %v855_v28  ;;  %vm2063_vm3 = vmmov %vm2029_vm0 }
 0x38c   :  { %v893_v50 = vpop.xlane.xlu1 %892  ;;  %v879_v4 = vpop.xlane.xlu0 %878 }
 0x38d   :  { %v916_v52 = vadd.f32 %v893_v50, %v868_v54  ;;  %v909_v16 = vadd.f32 %v879_v4, %v861_v62  ;;  %1228 = vpush %v1110_v30  ;;  %1310 = vpow2.f32 %v838_v43  ;;  %v858_v30 = vld [vmem:[#allocation3 + $0x70] sm:$0xff]  ;;  %v859_v4 = vld [vmem:[#allocation3 + $0x78] sm:$0xff] }
 0x38e   :  { %1312 = vpow2.f32 %v836_v38 }
 0x38f   :  { %933 = vst.msk [vmem:[#allocation3 + $0x40] sm:$0xff] %vm2046_vm1, %v916_v52  ;;  %1314 = vpow2.f32 %v840_v29 }
 0x390   :  { %926 = vst.msk [vmem:[#allocation3 + $0x8] sm:$0xff] %vm2047_vm13, %v909_v16  ;;  %v897_v46 = vpop.xlane.xlu1 %896  ;;  %v881_v24 = vpop.xlane.xlu0 %880  ;;  %1316 = vpow2.f32 %v842_v53 }
 0x391   :  { %v918_v25 = vadd.f32 %v897_v46, %v870_v11  ;;  %v910_v27 = vadd.f32 %v881_v24, %v862_v51 }
 0x393   :  { %935 = vst.msk [vmem:[#allocation3 + $0x50] sm:$0xff] %vm2048_vm14, %v918_v25 }
 0x394   :  { %927 = vst.msk [vmem:[#allocation3 + $0x10] sm:$0xff] %vm2049_vm5, %v910_v27  ;;  %v883_v15 = vpop.xlane.xlu0 %882 }
 0x395   :  { %v911_v33 = vadd.f32 %v883_v15, %v863_v0 }
 0x397   :  { %928 = vst.msk [vmem:[#allocation3 + $0x18] sm:$0xff] %vm2029_vm0, %v911_v33  ;;  %v1311_v32 = vpop.eup %1310 }
 0x398   :  { %v887_v6 = vpop.xlane.xlu0 %886  ;;  %v1313_v57 = vpop.eup %1312  ;;  %v873_v19 = vmul.f32 %v1311_v32, %v857_v36 }
 0x399   :  { %v913_v58 = vadd.f32 %v887_v6, %v865_v3  ;;  %v872_v44 = vmul.f32 %v1313_v57, %v856_v23  ;;  %v1315_v7 = vpop.eup %1314 }
 0x39a   :  { %v1317_v41 = vpop.eup %1316  ;;  %v874_v47 = vmul.f32 %v1315_v7, %v858_v30 }
 0x39b   :  { %930 = vst.msk [vmem:[#allocation3 + $0x28] sm:$0xff] %vm2050_vm8, %v913_v58  ;;  %v875_v52 = vmul.f32 %v1317_v41, %v859_v4 }
 0x39c   :  { %v891_v14 = vpop.xlane.xlu0 %890 }
 0x39d   :  { %v915_v12 = vadd.f32 %v891_v14, %v867_v56 }
 0x39f   :  { %932 = vst.msk [vmem:[#allocation3 + $0x38] sm:$0xff] %vm2051_vm7, %v915_v12 }
 0x3a0   :  { %v895_v42 = vpop.xlane.xlu0 %894 }
 0x3a1   :  { %v917_v49 = vadd.f32 %v895_v42, %v869_v34 }
 0x3a3   :  { %934 = vst.msk [vmem:[#allocation3 + $0x48] sm:$0xff] %vm2052_vm10, %v917_v49 }
 0x3be   :  { %s1229_s0 = spop %1228 }
 0x3bf   :  { %v1115_v39 = vstv %s1229_s0 }
 0x3c0   :  { %v1116_v61 = vsel %vm1114_vm4, %v1115_v39, 0.0 }
 0x3c1   :  { %1117 = vst [vmem:[%s1980_s4] sm:$0xff] %v1116_v61 }
 0x3dc   :  { %v899_v13 = vpop.xlane.xlu0 %898 }
 0x3dd   :  { %v919_v35 = vadd.f32 %v899_v13, %v871_v20 }
 0x3df   :  { %936 = vst.msk [vmem:[#allocation3 + $0x58] sm:$0xff] %vm2059_vm2, %v919_v35 }
 0x3e4   :  { %v903_v54 = vpop.xlane.xlu0 %902 }
 0x3e5   :  { %v921_v62 = vadd.f32 %v903_v54, %v873_v19 }
 0x3e7   :  { %938 = vst.msk [vmem:[#allocation3 + $0x68] sm:$0xff] %vm2060_vm15, %v921_v62  ;;  %v901_v45 = vpop.xlane.xlu1 %900 }
 0x3e8   :  { %v920_v50 = vadd.f32 %v901_v45, %v872_v44 }
 0x3ea   :  { %937 = vst.msk [vmem:[#allocation3 + $0x60] sm:$0xff] %vm2061_vm9, %v920_v50 }
 0x3eb   :  { %v905_v55 = vpop.xlane.xlu1 %904 }
 0x3ec   :  { %v922_v16 = vadd.f32 %v905_v55, %v874_v47  ;;  %v907_v48 = vpop.xlane.xlu0 %906 }
 0x3ed   :  { %v923_v1 = vadd.f32 %v907_v48, %v875_v52 }
 0x3ee   :  { %939 = vst.msk [vmem:[#allocation3 + $0x70] sm:$0xff] %vm2062_vm11, %v922_v16 }
 0x3ef   :  { %940 = vst.msk [vmem:[#allocation3 + $0x78] sm:$0xff] %vm2063_vm3, %v923_v1 }

</bundles_post_ra>
